<compile_context>
chip_gen: v6e
topology: v6e:2x2x1
jax: 0.10.0
libtpu: 0.0.40
codegen_flags: <defaults>
</compile_context>

<pallas_src>
import functools

import jax
import jax.numpy as jnp
from jax.experimental import pallas as pl
from jax.experimental.pallas import tpu as pltpu

IN_FEATURES = 28 * 28   # 784
OUT_FEATURES = 10
OUT_PAD = 128           # lane-dense padded class dimension used inside VMEM


def _round_up(n, m):
    return ((n + m - 1) // m) * m


def _vmem_working_set(tb, itemsize):
    """Per-step VMEM footprint: double-buffered x + output + resident params.

    The (tb, 10) output block is lane-padded to 128 lanes in VMEM, so budget it
    at OUT_PAD width.
    """
    return (2 * tb * IN_FEATURES * itemsize        # x tiles (double-buffered)
            + 2 * tb * OUT_PAD * 4                 # out tiles (double-buffered)
            + 2 * IN_FEATURES * OUT_PAD * itemsize # weights (double-buffered)
            + 2 * OUT_PAD * 4)                     # bias


def prepare_params(w, b, param_dtype=jnp.float32):
    """One-time prep of nn.Linear params (call at init, not per forward).

    w: [10, 784] (PyTorch nn.Linear layout), b: [10].
    Returns w_pad [784, 128] (zero-padded cols, param_dtype) and
    b_pad [1, 128] f32 (-1e30 in padded cols).
    """
    w_t = jnp.transpose(w).astype(param_dtype)                   # [784, 10]
    w_pad = jnp.zeros((IN_FEATURES, OUT_PAD), dtype=param_dtype)
    w_pad = w_pad.at[:, :OUT_FEATURES].set(w_t)
    b_pad = jnp.full((1, OUT_PAD), -1e30, dtype=jnp.float32)     # f32 only!
    b_pad = b_pad.at[:, :OUT_FEATURES].set(b.astype(jnp.float32))
    return w_pad, b_pad


def linear_softmax_kernel(x_ref, w_ref, b_ref, o_ref):
    # x_ref: (tb, 784), w_ref: (784, 128), b_ref: (1, 128) f32, o_ref: (tb, 10) f32.
    # MXU matmul with f32 accumulation; bias broadcast over batch rows.
    logits = jnp.dot(x_ref[...], w_ref[...],
                     preferred_element_type=jnp.float32) + b_ref[...]
    # Numerically stable softmax over the lane-dense padded class axis.
    # Padded columns have logit ~-1e30 -> exp underflows to exactly 0.
    m = jnp.max(logits, axis=-1, keepdims=True)
    e = jnp.exp(logits - m)
    denom = jnp.sum(e, axis=-1, keepdims=True)
    probs = e * pl.reciprocal(denom, approx=False)   # exact for 1e-5 tolerance
    # Narrow HBM writeback: only the 10 real classes leave VMEM.
    o_ref[...] = probs[:, :OUT_FEATURES].astype(o_ref.dtype)


@functools.partial(jax.jit, static_argnames=("tile_b", "vmem_limit_bytes"))
def linear_net_forward(x, w_pad, b_pad, *, tile_b=2048,
                       vmem_limit_bytes=48 * 1024 * 1024):
    """softmax(x @ W.T + b) with shape [B, 10] (float32).

    x: [B, 784] (f32, or bf16 if it already lives in bf16 upstream).
    w_pad, b_pad: outputs of prepare_params().
    """
    B = x.shape[0]
    if x.dtype != w_pad.dtype:
        # Never re-stream x through HBM just to change dtype; cast the tiny
        # weight matrix instead.  x's HBM-resident dtype is authoritative.
        w_pad = w_pad.astype(x.dtype)
    itemsize = jnp.dtype(x.dtype).itemsize

    # Tile rows: big enough to amortize ~0.35us/step overhead, capped so that
    # large B still yields >= ~8 grid steps (v7x: 2 TCs share HBM bandwidth),
    # and clamped to the VMEM budget.  Always a multiple of 8.
    tb = max(8, min(tile_b, _round_up(pl.cdiv(B, 8), 8)))
    budget = int(vmem_limit_bytes * 0.85)
    while tb > 8 and _vmem_working_set(tb, itemsize) > budget:
        tb = max(8, _round_up(tb // 2, 8))

    # Ragged batches: no wrapper-side padding; Pallas masks the partial last
    # block (reads of the out-of-bounds rows are garbage but row-independent,
    # and their writes are dropped).
    grid = (pl.cdiv(B, tb),)

    cost = pl.CostEstimate(
        flops=2 * B * IN_FEATURES * OUT_PAD,
        transcendentals=B * OUT_PAD,
        bytes_accessed=(B * IN_FEATURES * itemsize          # x read
                        + IN_FEATURES * OUT_PAD * itemsize  # weights read
                        + OUT_PAD * 4                       # bias read
                        + B * OUT_FEATURES * 4),            # output write
    )

    out = pl.pallas_call(
        linear_softmax_kernel,
        out_shape=jax.ShapeDtypeStruct((B, OUT_FEATURES), jnp.float32),
        grid_spec=pltpu.PrefetchScalarGridSpec(
            num_scalar_prefetch=0,
            grid=grid,
            in_specs=[
                # x: one batch tile per grid step (double-buffered pipeline).
                pl.BlockSpec((tb, IN_FEATURES), lambda i: (i, 0)),
                # Weights / bias: constant index map -> stay VMEM-resident.
                pl.BlockSpec((IN_FEATURES, OUT_PAD), lambda i: (0, 0)),
                pl.BlockSpec((1, OUT_PAD), lambda i: (0, 0)),
            ],
            # Last block dim (10) equals the full array dim -> legal block.
            out_specs=pl.BlockSpec((tb, OUT_FEATURES), lambda i: (i, 0)),
        ),
        compiler_params=pltpu.CompilerParams(
            dimension_semantics=("parallel",),   # shard batch tiles across TCs
            vmem_limit_bytes=vmem_limit_bytes,
        ),
        cost_estimate=cost,
    )(x, w_pad, b_pad)
    return out


if __name__ == "__main__":
    key = jax.random.PRNGKey(0)
    k_x, k_w, k_b, k_x2 = jax.random.split(key, 4)

    # Deterministic parameter init mimicking PyTorch's Linear default
    # (uniform in +-1/sqrt(fan_in)); synthetic, not a checkpoint load.
    bound = 1.0 / jnp.sqrt(jnp.float32(IN_FEATURES))
    w = jax.random.uniform(k_w, (OUT_FEATURES, IN_FEATURES),
                           minval=-bound, maxval=bound, dtype=jnp.float32)
    b = jax.random.uniform(k_b, (OUT_FEATURES,),
                           minval=-bound, maxval=bound, dtype=jnp.float32)

    # One-time parameter prep (hoisted out of the forward pass).
    w_pad_f32, b_pad = prepare_params(w, b, jnp.float32)
    w_pad_bf16, _ = prepare_params(w, b, jnp.bfloat16)

    # --- Small test (B=8), f32 path, single grid step ----------------------
    B = 8
    x = jax.random.normal(k_x, (B, IN_FEATURES), dtype=jnp.float32)
    out = jax.block_until_ready(linear_net_forward(x, w_pad_f32, b_pad))
    ref = jax.nn.softmax(x @ w.T + b[None, :], axis=-1)
    assert out.shape == (B, OUT_FEATURES)
    assert jnp.allclose(out, ref, atol=1e-5, rtol=1e-5)
    assert jnp.allclose(jnp.sum(out, axis=-1), 1.0, atol=1e-5)

    # --- Ragged batch (B=100): multi-step grid + masked partial last block --
    B2 = 100
    x2 = jax.random.normal(k_x2, (B2, IN_FEATURES), dtype=jnp.float32)
    out2 = jax.block_until_ready(linear_net_forward(x2, w_pad_f32, b_pad))
    ref2 = jax.nn.softmax(x2 @ w.T + b[None, :], axis=-1)
    assert out2.shape == (B2, OUT_FEATURES)
    assert jnp.allclose(out2, ref2, atol=1e-5, rtol=1e-5)

    # --- bf16 path: x already bf16 upstream (no wrapper cast), f32 accum ----
    x2_bf16 = x2.astype(jnp.bfloat16)
    out_bf16 = jax.block_until_ready(
        linear_net_forward(x2_bf16, w_pad_bf16, b_pad))
    ref_bf16 = jax.nn.softmax(
        x2_bf16.astype(jnp.float32) @ w.T.astype(jnp.bfloat16).astype(jnp.float32)
        + b[None, :], axis=-1)
    assert jnp.allclose(out_bf16, ref_bf16, atol=1e-3, rtol=1e-3)
    assert jnp.allclose(jnp.sum(out_bf16, axis=-1), 1.0, atol=1e-3)

    print("KERNEL_OK")
</pallas_src>

<mosaic_0001>
module attributes {stable_mosaic.version = 11 : i64} {
  func.func @linear_softmax_kernel(%arg0: i32, %arg1: memref<8x784xf32, #tpu.memory_space<vmem>>, %arg2: memref<784x128xf32, #tpu.memory_space<vmem>>, %arg3: memref<1x128xf32, #tpu.memory_space<vmem>>, %arg4: memref<8x10xf32, #tpu.memory_space<vmem>>) attributes {dimension_semantics = [#tpu.dimension_semantics<parallel>], iteration_bounds = array<i64: 1>, scalar_prefetch = 0 : i64, scratch_operands = 0 : i64, tpu.core_type = #tpu.core_type<tc>, window_params = [{transform_indices = @transform_0, window_bounds = array<i64: 8, 784>}, {pipeline_mode = #tpu.pipeline_mode<synchronous>, transform_indices = @transform_1, window_bounds = array<i64: 784, 128>}, {pipeline_mode = #tpu.pipeline_mode<synchronous>, transform_indices = @transform_2, window_bounds = array<i64: 1, 128>}, {transform_indices = @transform_3, window_bounds = array<i64: 8, 10>}]} {
    %c0 = arith.constant 0 : index
    %c0_0 = arith.constant 0 : index
    %0 = vector.load %arg1[%c0, %c0_0] : memref<8x784xf32, #tpu.memory_space<vmem>>, vector<8x784xf32>
    %c0_1 = arith.constant 0 : index
    %c0_2 = arith.constant 0 : index
    %1 = vector.load %arg2[%c0_1, %c0_2] : memref<784x128xf32, #tpu.memory_space<vmem>>, vector<784x128xf32>
    %cst = arith.constant dense<0.000000e+00> : vector<8x128xf32>
    %2 = tpu.matmul %0, %1, %cst {dimension_numbers = #tpu.dot_dimension_numbers<[1], [0], [0], [1], [0, 0, 1, 1], [], []>} : vector<8x784xf32>, vector<784x128xf32>, vector<8x128xf32> -> vector<8x128xf32>
    %c0_3 = arith.constant 0 : index
    %c0_4 = arith.constant 0 : index
    %3 = vector.load %arg3[%c0_3, %c0_4] : memref<1x128xf32, #tpu.memory_space<vmem>>, vector<1x128xf32>
    %4 = vector.broadcast %3 : vector<1x128xf32> to vector<8x128xf32>
    %5 = arith.addf %2, %4 : vector<8x128xf32>
    %cst_5 = arith.constant dense<0xFF800000> : vector<8xf32>
    %6 = vector.multi_reduction <maximumf>, %5, %cst_5 [1] : vector<8x128xf32> to vector<8xf32>
    %7 = vector.shape_cast %6 : vector<8xf32> to vector<8x1xf32>
    %8 = vector.broadcast %7 : vector<8x1xf32> to vector<8x128xf32>
    %9 = arith.subf %5, %8 : vector<8x128xf32>
    %10 = math.exp %9 : vector<8x128xf32>
    %cst_6 = arith.constant dense<0.000000e+00> : vector<8xf32>
    %11 = vector.multi_reduction <add>, %10, %cst_6 [1] : vector<8x128xf32> to vector<8xf32>
    %12 = vector.shape_cast %11 : vector<8xf32> to vector<8x1xf32>
    %13 = tpu.reciprocal %12 : vector<8x1xf32> -> vector<8x1xf32>
    %14 = vector.broadcast %13 : vector<8x1xf32> to vector<8x128xf32>
    %15 = arith.mulf %10, %14 : vector<8x128xf32>
    %16 = vector.extract_strided_slice %15 {offsets = [0, 0], sizes = [8, 10], strides = [1, 1]} : vector<8x128xf32> to vector<8x10xf32>
    %c0_7 = arith.constant 0 : index
    %c0_8 = arith.constant 0 : index
    %17 = vector.load %arg4[%c0_7, %c0_8] : memref<8x10xf32, #tpu.memory_space<vmem>>, vector<8x10xf32>
    tpu.vector_store %arg4[%c0_7, %c0_8], %16 {strides = array<i32>} : memref<8x10xf32, #tpu.memory_space<vmem>>, vector<8x10xf32>,
    return
  }
  func.func @transform_0(%arg0: i32) -> (i32, i32) {
    %c0_i32 = arith.constant 0 : i32
    %c0_i32_0 = arith.constant 0 : i32
    return %arg0, %c0_i32 : i32, i32
  }
  func.func @transform_1(%arg0: i32) -> (i32, i32) {
    %c0_i32 = arith.constant 0 : i32
    %c0_i32_0 = arith.constant 0 : i32
    %c0_i32_1 = arith.constant 0 : i32
    return %c0_i32, %c0_i32_0 : i32, i32
  }
  func.func @transform_2(%arg0: i32) -> (i32, i32) {
    %c0_i32 = arith.constant 0 : i32
    %c0_i32_0 = arith.constant 0 : i32
    %c0_i32_1 = arith.constant 0 : i32
    return %c0_i32, %c0_i32_0 : i32, i32
  }
  func.func @transform_3(%arg0: i32) -> (i32, i32) {
    %c0_i32 = arith.constant 0 : i32
    %c0_i32_0 = arith.constant 0 : i32
    return %arg0, %c0_i32 : i32, i32
  }
}

</mosaic_0001>

<bundles_post_ra>
// kernel: linear_net_forward.1
= control target key start
LH: loop header
LB: loop body
LE: loop exit
PB: predicated region body
PF: predicated region fallthrough
CT: control target
= control target key end

     0   :  { %8 = vsyncpa [#allocation3], 0  ;;  %s697_s0 = inlined_call_operand.hbm [shape: f32[8,784], index: 0, kind: input, shape index: {}]   ;;  %s698_s1 = inlined_call_operand.hbm [shape: f32[784,128], index: 1, kind: input, shape index: {}]   ;;  %s699_s2 = inlined_call_operand.vmem [shape: f32[1,128], index: 2, kind: input, shape index: {}]   ;;  %s700_s3 = inlined_call_operand.hbm [shape: f32[8,10], index: 3, kind: output, shape index: {}]  }
   0x1   :  { %9 = vsyncpa [#allocation6], 0 }
   0x2   :  { %10 = vsyncpa [#allocation4], 0  ;;  %s658_s12 = smov [#allocation2]   ;;  %s659_s14 = smov [#allocation5]  }
   0x3   :  { %s17_s13 = sshll.u32 %s658_s12, 4  ;;  %s26_s15 = sshll.u32 %s659_s14, 4  ;;  %s18_s13 = int_to_ptr.vmem [resolvable:$true] %s17_s13  ;;  %s27_s15 = int_to_ptr.vmem [resolvable:$true] %s26_s15 }
   0x4   :  { %s600_s16 = scalar_lea.vmem %s18_s13, 896  ;;  %p605_p1 = scmp.lt.s32.totalorder %s18_s13, %s18_s13 }
   0x5   :  { %p601_p0 = scmp.ne.s32.totalorder %s18_s13, %s600_s16  ;;  %p606_p2 = scmp.lt.s32.totalorder %s600_s16, %s600_s16 }
   0x7   :  { %p607_p3 = por %p606_p2, %p605_p1 }
   0x9   :  { %p608_p4 = pnand %p607_p3, %p601_p0 }
   0xb   :  { %611 = shalt.err (!%p608_p4)
}
   0xc   :  { %20 = dma.hbm_to_vmem [thread:$0]  %s697_s0, 896, %s18_s13, [#allocation3]  }
   0xd   :  { %s620_s19 = scalar_lea.vmem %s27_s15, 12544  ;;  %p625_p6 = scmp.lt.s32.totalorder %s27_s15, %s27_s15 }
   0xe   :  { %p621_p5 = scmp.ne.s32.totalorder %s27_s15, %s620_s19  ;;  %p626_p7 = scmp.lt.s32.totalorder %s620_s19, %s620_s19 }
  0x10   :  { %p627_p8 = por %p626_p7, %p625_p6 }
  0x12   :  { %p628_p9 = pnand %p627_p8, %p621_p5 }
  0x14   :  { %631 = shalt.err (!%p628_p9)
}
  0x15   :  { %s660_s20 = smov 128   ;;  %s661_s21 = smov 8  }
  0x16   :  { %32 = dma.hbm_to_vmem [thread:$0]  %s698_s1, 12544, %s27_s15, [#allocation6], %s660_s20, %s660_s20, %s661_s21  }
  0x17   :  { %652 = dma.done.wait [#allocation3], 896  }
  0x18   :  { %653 = vsyncadd [#allocation3], 4294966400 }
  0x19   :  { %654 = dma.done.wait [#allocation6], 12544  }
  0x1a   :  { %655 = vsyncadd [#allocation6], 4294954752  ;;  %v79_v0 = vld [vmem:[#allocation5 + $0xf8] sm:$0xff]  ;;  %v78_v2 = vld [vmem:[#allocation5 + $0xf0] sm:$0xff]  ;;  %vm153_vm0 = vcmask 130048   ;;  %vm663_vm1 = vmmov 0  }
  0x1b   :  { %v63_v1 = vld [vmem:[#allocation5 + $0x78] sm:$0xff]  ;;  %466 = vmatprep.subr.mxu0 %v79_v0  ;;  %v62_v4 = vld [vmem:[#allocation5 + $0x70] sm:$0xff]  ;;  %v77_v6 = vld [vmem:[#allocation5 + $0xe8] sm:$0xff]  ;;  %s664_s24 = smov [#allocation7]   ;;  %vm446_vm2 = vcmask 80896  }
  0x1c   :  { %v111_v3 = vld [vmem:[#allocation5 + $0x1f8] sm:$0xff]  ;;  %467 = vmatpush3.msra.mxu0 %v63_v1  ;;  %v110_v7 = vld [vmem:[#allocation5 + $0x1f0] sm:$0xff]  ;;  %v61_v8 = vld [vmem:[#allocation5 + $0x68] sm:$0xff]  ;;  %s454_s25 = sshll.u32 %s664_s24, 4  ;;  %s455_s25 = int_to_ptr.vmem [resolvable:$true] %s454_s25 }
  0x1d   :  { %v95_v5 = vld [vmem:[#allocation5 + $0x178] sm:$0xff]  ;;  %501 = vmatprep.subr.mxu1 %v111_v3  ;;  %468 = vmatprep.subr.mxu0 %v78_v2  ;;  %v94_v9 = vld [vmem:[#allocation5 + $0x170] sm:$0xff]  ;;  %v109_v10 = vld [vmem:[#allocation5 + $0x1e8] sm:$0xff]  ;;  %p637_p11 = scmp.lt.s32.totalorder %s455_s25, %s455_s25 }
  0x1e   :  { %502 = vmatpush3.msra.mxu1 %v95_v5  ;;  %469 = vmatpush3.msra.mxu0 %v62_v4  ;;  %v76_v11 = vld [vmem:[#allocation5 + $0xe0] sm:$0xff]  ;;  %v93_v12 = vld [vmem:[#allocation5 + $0x168] sm:$0xff]  ;;  %v75_v15 = vld [vmem:[#allocation5 + $0xd8] sm:$0xff] }
  0x1f   :  { %503 = vmatprep.subr.mxu1 %v110_v7  ;;  %470 = vmatprep.subr.mxu0 %v77_v6  ;;  %v60_v13 = vld [vmem:[#allocation5 + $0x60] sm:$0xff]  ;;  %v59_v17 = vld [vmem:[#allocation5 + $0x58] sm:$0xff]  ;;  %v74_v19 = vld [vmem:[#allocation5 + $0xd0] sm:$0xff] }
  0x20   :  { %504 = vmatpush3.msra.mxu1 %v94_v9  ;;  %v108_v14 = vld [vmem:[#allocation5 + $0x1e0] sm:$0xff]  ;;  %471 = vmatpush3.msra.mxu0 %v61_v8  ;;  %v107_v18 = vld [vmem:[#allocation5 + $0x1d8] sm:$0xff]  ;;  %v58_v21 = vld [vmem:[#allocation5 + $0x50] sm:$0xff] }
  0x21   :  { %505 = vmatprep.subr.mxu1 %v109_v10  ;;  %v92_v16 = vld [vmem:[#allocation5 + $0x160] sm:$0xff]  ;;  %472 = vmatprep.subr.mxu0 %v76_v11  ;;  %v91_v20 = vld [vmem:[#allocation5 + $0x158] sm:$0xff]  ;;  %v106_v22 = vld [vmem:[#allocation5 + $0x1d0] sm:$0xff] }
  0x22   :  { %506 = vmatpush3.msra.mxu1 %v93_v12  ;;  %473 = vmatpush3.msra.mxu0 %v60_v13  ;;  %v73_v23 = vld [vmem:[#allocation5 + $0xc8] sm:$0xff]  ;;  %v90_v24 = vld [vmem:[#allocation5 + $0x150] sm:$0xff]  ;;  %v72_v27 = vld [vmem:[#allocation5 + $0xc0] sm:$0xff] }
  0x23   :  { %507 = vmatprep.subr.mxu1 %v108_v14  ;;  %474 = vmatprep.subr.mxu0 %v75_v15  ;;  %v57_v25 = vld [vmem:[#allocation5 + $0x48] sm:$0xff]  ;;  %v56_v29 = vld [vmem:[#allocation5 + $0x40] sm:$0xff]  ;;  %v71_v31 = vld [vmem:[#allocation5 + $0xb8] sm:$0xff]  ;;  %v662_v14 = vmov 0.0  }
  0x24   :  { %508 = vmatpush3.msra.mxu1 %v92_v16  ;;  %475 = vmatpush3.msra.mxu0 %v59_v17  ;;  %v105_v26 = vld [vmem:[#allocation5 + $0x1c8] sm:$0xff]  ;;  %v104_v30 = vld [vmem:[#allocation5 + $0x1c0] sm:$0xff]  ;;  %v55_v33 = vld [vmem:[#allocation5 + $0x38] sm:$0xff] }
  0x25   :  { %509 = vmatprep.subr.mxu1 %v107_v18  ;;  %476 = vmatprep.subr.mxu0 %v74_v19  ;;  %v89_v28 = vld [vmem:[#allocation5 + $0x148] sm:$0xff]  ;;  %v88_v32 = vld [vmem:[#allocation5 + $0x140] sm:$0xff]  ;;  %v103_v34 = vld [vmem:[#allocation5 + $0x1b8] sm:$0xff] }
  0x26   :  { %510 = vmatpush3.msra.mxu1 %v91_v20  ;;  %477 = vmatpush3.msra.mxu0 %v58_v21  ;;  %v70_v35 = vld [vmem:[#allocation5 + $0xb0] sm:$0xff]  ;;  %v87_v36 = vld [vmem:[#allocation5 + $0x138] sm:$0xff]  ;;  %v69_v39 = vld [vmem:[#allocation5 + $0xa8] sm:$0xff] }
  0x27   :  { %511 = vmatprep.subr.mxu1 %v106_v22  ;;  %478 = vmatprep.subr.mxu0 %v73_v23  ;;  %v54_v37 = vld [vmem:[#allocation5 + $0x30] sm:$0xff]  ;;  %v53_v41 = vld [vmem:[#allocation5 + $0x28] sm:$0xff]  ;;  %v68_v43 = vld [vmem:[#allocation5 + $0xa0] sm:$0xff] }
  0x28   :  { %512 = vmatpush3.msra.mxu1 %v90_v24  ;;  %479 = vmatpush3.msra.mxu0 %v57_v25  ;;  %v102_v38 = vld [vmem:[#allocation5 + $0x1b0] sm:$0xff]  ;;  %v101_v42 = vld [vmem:[#allocation5 + $0x1a8] sm:$0xff]  ;;  %v52_v45 = vld [vmem:[#allocation5 + $0x20] sm:$0xff] }
  0x29   :  { %513 = vmatprep.subr.mxu1 %v105_v26  ;;  %480 = vmatprep.subr.mxu0 %v72_v27  ;;  %v86_v40 = vld [vmem:[#allocation5 + $0x130] sm:$0xff]  ;;  %v85_v44 = vld [vmem:[#allocation5 + $0x128] sm:$0xff]  ;;  %v100_v46 = vld [vmem:[#allocation5 + $0x1a0] sm:$0xff] }
  0x2a   :  { %514 = vmatpush3.msra.mxu1 %v89_v28  ;;  %481 = vmatpush3.msra.mxu0 %v56_v29  ;;  %v67_v47 = vld [vmem:[#allocation5 + $0x98] sm:$0xff]  ;;  %v84_v48 = vld [vmem:[#allocation5 + $0x120] sm:$0xff]  ;;  %v66_v51 = vld [vmem:[#allocation5 + $0x90] sm:$0xff] }
  0x2b   :  { %515 = vmatprep.subr.mxu1 %v104_v30  ;;  %482 = vmatprep.subr.mxu0 %v71_v31  ;;  %v51_v49 = vld [vmem:[#allocation5 + $0x18] sm:$0xff]  ;;  %v50_v53 = vld [vmem:[#allocation5 + $0x10] sm:$0xff]  ;;  %v65_v55 = vld [vmem:[#allocation5 + $0x88] sm:$0xff] }
  0x2c   :  { %516 = vmatpush3.msra.mxu1 %v88_v32  ;;  %483 = vmatpush3.msra.mxu0 %v55_v33  ;;  %v99_v50 = vld [vmem:[#allocation5 + $0x198] sm:$0xff]  ;;  %v98_v54 = vld [vmem:[#allocation5 + $0x190] sm:$0xff]  ;;  %v49_v57 = vld [vmem:[#allocation5 + $0x8] sm:$0xff] }
  0x2d   :  { %517 = vmatprep.subr.mxu1 %v103_v34  ;;  %484 = vmatprep.subr.mxu0 %v70_v35  ;;  %v83_v52 = vld [vmem:[#allocation5 + $0x118] sm:$0xff]  ;;  %v82_v56 = vld [vmem:[#allocation5 + $0x110] sm:$0xff]  ;;  %v97_v58 = vld [vmem:[#allocation5 + $0x188] sm:$0xff] }
  0x2e   :  { %518 = vmatpush3.msra.mxu1 %v87_v36  ;;  %485 = vmatpush3.msra.mxu0 %v54_v37  ;;  %v64_v59 = vld [vmem:[#allocation5 + $0x80] sm:$0xff]  ;;  %v42_v60 = vld [vmem:[#allocation2 + $0x8] sm:$0xff]  ;;  %v81_v62 = vld [vmem:[#allocation5 + $0x108] sm:$0xff] }
  0x2f   :  { %519 = vmatprep.subr.mxu1 %v102_v38  ;;  %486 = vmatprep.subr.mxu0 %v69_v39  ;;  %v48_v61 = vld [vmem:[#allocation5] sm:$0xff]  ;;  %v41_v63 = vld [vmem:[#allocation2] sm:$0xff]  ;;  %v143_v1 = vld [vmem:[#allocation5 + $0x2f8] sm:$0xff] }
  0x30   :  { %520 = vmatpush3.msra.mxu1 %v86_v40  ;;  %487 = vmatpush3.msra.mxu0 %v53_v41  ;;  %v96_v0 = vld [vmem:[#allocation5 + $0x180] sm:$0xff]  ;;  %v127_v4 = vld [vmem:[#allocation5 + $0x278] sm:$0xff]  ;;  %v142_v6 = vld [vmem:[#allocation5 + $0x2f0] sm:$0xff] }
  0x31   :  { %521 = vmatprep.subr.mxu1 %v101_v42  ;;  %488 = vmatprep.subr.mxu0 %v68_v43  ;;  %v80_v2 = vld [vmem:[#allocation5 + $0x100] sm:$0xff]  ;;  %v43_v5 = vld [vmem:[#allocation2 + $0x10] sm:$0xff]  ;;  %v126_v7 = vld [vmem:[#allocation5 + $0x270] sm:$0xff] }
  0x32   :  { %522 = vmatpush3.msra.mxu1 %v85_v44  ;;  %489 = vmatpush3.msra.mxu0 %v52_v45  ;;  %v44_v3 = vld [vmem:[#allocation2 + $0x18] sm:$0xff]  ;;  %v46_v8 = vld [vmem:[#allocation2 + $0x28] sm:$0xff]  ;;  %v141_v9 = vld [vmem:[#allocation5 + $0x2e8] sm:$0xff] }
  0x33   :  { %523 = vmatprep.subr.mxu1 %v100_v46  ;;  %490 = vmatprep.subr.mxu0 %v67_v47  ;;  %v125_v10 = vld [vmem:[#allocation5 + $0x268] sm:$0xff]  ;;  %v140_v12 = vld [vmem:[#allocation5 + $0x2e0] sm:$0xff]  ;;  %v139_v16 = vld [vmem:[#allocation5 + $0x2d8] sm:$0xff] }
  0x34   :  { %524 = vmatpush3.msra.mxu1 %v84_v48  ;;  %491 = vmatpush3.msra.mxu0 %v51_v49  ;;  %v145_v11 = vld [vmem:[#allocation5 + $0x308] sm:$0xff]  ;;  %v124_v13 = vld [vmem:[#allocation5 + $0x260] sm:$0xff]  ;;  %v123_v17 = vld [vmem:[#allocation5 + $0x258] sm:$0xff] }
  0x35   :  { %525 = vmatprep.subr.mxu1 %v99_v50  ;;  %492 = vmatprep.subr.mxu0 %v66_v51  ;;  %v144_v15 = vld [vmem:[#allocation5 + $0x300] sm:$0xff]  ;;  %v47_v18 = vld [vmem:[#allocation2 + $0x30] sm:$0xff]  ;;  %v138_v19 = vld [vmem:[#allocation5 + $0x2d0] sm:$0xff] }
  0x36   :  { %526 = vmatpush3.msra.mxu1 %v83_v52  ;;  %493 = vmatpush3.msra.mxu0 %v50_v53  ;;  %v122_v20 = vld [vmem:[#allocation5 + $0x250] sm:$0xff]  ;;  %v137_v21 = vld [vmem:[#allocation5 + $0x2c8] sm:$0xff]  ;;  %v136_v23 = vld [vmem:[#allocation5 + $0x2c0] sm:$0xff] }
  0x37   :  { %527 = vmatprep.subr.mxu1 %v98_v54  ;;  %494 = vmatprep.subr.mxu0 %v65_v55  ;;  %v121_v22 = vld [vmem:[#allocation5 + $0x248] sm:$0xff]  ;;  %v120_v24 = vld [vmem:[#allocation5 + $0x240] sm:$0xff]  ;;  %v135_v25 = vld [vmem:[#allocation5 + $0x2b8] sm:$0xff] }
  0x38   :  { %528 = vmatpush3.msra.mxu1 %v82_v56  ;;  %495 = vmatpush3.msra.mxu0 %v49_v57  ;;  %v119_v26 = vld [vmem:[#allocation5 + $0x238] sm:$0xff]  ;;  %v134_v27 = vld [vmem:[#allocation5 + $0x2b0] sm:$0xff]  ;;  %v133_v29 = vld [vmem:[#allocation5 + $0x2a8] sm:$0xff] }
  0x39   :  { %529 = vmatprep.subr.mxu1 %v97_v58  ;;  %496 = vmatprep.subr.mxu0 %v64_v59  ;;  %v118_v28 = vld [vmem:[#allocation5 + $0x230] sm:$0xff]  ;;  %v117_v30 = vld [vmem:[#allocation5 + $0x228] sm:$0xff]  ;;  %v132_v31 = vld [vmem:[#allocation5 + $0x2a0] sm:$0xff] }
  0x3a   :  { %221 = vmatprep.mubr.f32.mxu0 %v42_v60  ;;  %497 = vmatpush3.msra.mxu0 %v48_v61  ;;  %v116_v32 = vld [vmem:[#allocation5 + $0x220] sm:$0xff]  ;;  %v131_v33 = vld [vmem:[#allocation5 + $0x298] sm:$0xff]  ;;  %v130_v35 = vld [vmem:[#allocation5 + $0x290] sm:$0xff] }
  0x3b   :  { %530 = vmatpush3.msra.mxu1 %v81_v62  ;;  %222 = vmatmul.mubr.f32.vlgmr.msra.gmra.mxu0 %v41_v63  ;;  %v115_v34 = vld [vmem:[#allocation5 + $0x218] sm:$0xff]  ;;  %v114_v36 = vld [vmem:[#allocation5 + $0x210] sm:$0xff]  ;;  %v129_v37 = vld [vmem:[#allocation5 + $0x288] sm:$0xff] }
  0x3c   :  { %531 = vmatprep.subr.mxu1 %v96_v0  ;;  %536 = vmatprep.subr.mxu0 %v143_v1  ;;  %v113_v38 = vld [vmem:[#allocation5 + $0x208] sm:$0xff]  ;;  %v128_v39 = vld [vmem:[#allocation5 + $0x280] sm:$0xff] }
  0x3d   :  { %532 = vmatpush3.msra.mxu1 %v80_v2  ;;  %291 = vmatprep.mubr.f32.mxu1 %v44_v3  ;;  %v112_v40 = vld [vmem:[#allocation5 + $0x200] sm:$0xff]  ;;  %v45_v41 = vld [vmem:[#allocation2 + $0x20] sm:$0xff] }
  0x3e   :  { %537 = vmatpush3.msra.mxu0 %v127_v4  ;;  %292 = vmatmul.mubr.f32.vlgmr.msra.gmra.mxu1 %v43_v5  ;;  %v464_v49 = vld [vmem:[%s699_s2] ss:$0 sm:$0xff]  ;;  %s632_s2 = scalar_lea.vmem %s455_s25, 128 }
  0x3f   :  { %538 = vmatprep.subr.mxu0 %v142_v6  ;;  %361 = vmatprep.mubr.f32.mxu0 %v46_v8  ;;  %p633_p10 = scmp.ne.s32.totalorder %s455_s25, %s632_s2  ;;  %p638_p12 = scmp.lt.s32.totalorder %s632_s2, %s632_s2 }
  0x40   :  { %539 = vmatpush3.msra.mxu0 %v126_v7  ;;  %574 = vmatprep.subr.mxu1 %v662_v14 }
  0x41   :  { %540 = vmatprep.subr.mxu0 %v141_v9  ;;  %575 = vmatpush3.msra.mxu1 %v145_v11  ;;  %p639_p13 = por %p638_p12, %p637_p11 }
  0x42   :  { %541 = vmatpush3.msra.mxu0 %v125_v10  ;;  %576 = vmatprep.subr.mxu1 %v662_v14 }
  0x43   :  { %542 = vmatprep.subr.mxu0 %v140_v12  ;;  %577 = vmatpush3.msra.mxu1 %v144_v15  ;;  %p640_p0 = pnand %p639_p13, %p633_p10 }
  0x44   :  { %543 = vmatpush3.msra.mxu0 %v124_v13  ;;  %578 = vmatprep.mubr.msk.f32.mxu1 %vm663_vm1, %v662_v14 }
  0x45   :  { %544 = vmatprep.subr.mxu0 %v139_v16  ;;  %579 = vmatmul.mubr.msk.f32.vlgmr.msra.gmra.mxu1 %vm153_vm0, %v47_v18 }
  0x46   :  { %545 = vmatpush3.msra.mxu0 %v123_v17 }
  0x47   :  { %546 = vmatprep.subr.mxu0 %v138_v19 }
  0x48   :  { %547 = vmatpush3.msra.mxu0 %v122_v20 }
  0x49   :  { %548 = vmatprep.subr.mxu0 %v137_v21 }
  0x4a   :  { %549 = vmatpush3.msra.mxu0 %v121_v22 }
  0x4b   :  { %550 = vmatprep.subr.mxu0 %v136_v23 }
  0x4c   :  { %551 = vmatpush3.msra.mxu0 %v120_v24 }
  0x4d   :  { %552 = vmatprep.subr.mxu0 %v135_v25 }
  0x4e   :  { %553 = vmatpush3.msra.mxu0 %v119_v26 }
  0x4f   :  { %554 = vmatprep.subr.mxu0 %v134_v27 }
  0x50   :  { %555 = vmatpush3.msra.mxu0 %v118_v28 }
  0x51   :  { %556 = vmatprep.subr.mxu0 %v133_v29 }
  0x52   :  { %557 = vmatpush3.msra.mxu0 %v117_v30 }
  0x53   :  { %558 = vmatprep.subr.mxu0 %v132_v31 }
  0x54   :  { %559 = vmatpush3.msra.mxu0 %v116_v32 }
  0x55   :  { %560 = vmatprep.subr.mxu0 %v131_v33 }
  0x56   :  { %561 = vmatpush3.msra.mxu0 %v115_v34 }
  0x57   :  { %562 = vmatprep.subr.mxu0 %v130_v35 }
  0x58   :  { %563 = vmatpush3.msra.mxu0 %v114_v36 }
  0x59   :  { %564 = vmatprep.subr.mxu0 %v129_v37 }
  0x5a   :  { %565 = vmatpush3.msra.mxu0 %v113_v38 }
  0x5b   :  { %566 = vmatprep.subr.mxu0 %v128_v39 }
  0x5c   :  { %567 = vmatpush3.msra.mxu0 %v112_v40 }
  0x5d   :  { %362 = vmatmul.mubr.f32.vlgmr.msra.gmra.mxu0 %v45_v41 }
  0xfb   :  { %v498_v46 = vpop.f32.mrf.mxu0 }
  0xfd   :  { %v499_v47 = vpop.f32.mrf.mxu0 }
  0xfe   :  { %v533_v42 = vpop.f32.mrf.mxu1  ;;  %v500_v48 = vadd.f32 %v499_v47, %v498_v46 }
 0x100   :  { %v534_v43 = vpop.f32.mrf.mxu1  ;;  %v224_v50 = vadd.f32 %v500_v48, %v464_v49 }
 0x101   :  { %v535_v51 = vadd.f32 %v534_v43, %v533_v42 }
 0x103   :  { %v294_v54 = vadd.f32 %v535_v51, %v224_v50 }
 0x105   :  { %v433_v44 = vpop.f32.mrf.mxu1 }
 0x107   :  { %v580_v45 = vpop.f32.mrf.mxu1 }
 0x11d   :  { %v568_v52 = vpop.f32.mrf.mxu0 }
 0x11f   :  { %v569_v53 = vpop.f32.mrf.mxu0 }
 0x120   :  { %v570_v55 = vadd.f32 %v569_v53, %v568_v52 }
 0x122   :  { %v364_v56 = vadd.f32 %v570_v55, %v294_v54 }
 0x124   :  { %v434_v57 = vadd.f32 %v433_v44, %v364_v56 }
 0x126   :  { %437 = vmax.xlane.f32.xlu0 %v434_v57 }
 0x1af   :  { %v438_v58 = vpop.xlane.xlu0 %437 }
 0x1b0   :  { %v439_v59 = vsub.f32 %v434_v57, %v438_v58 }
 0x1b2   :  { %v440_v60 = vmul.f32 1.442695, %v439_v59 }
 0x1b4   :  { %588 = vpow2.f32 %v440_v60 }
 0x1c1   :  { %v589_v61 = vpop.eup %588 }
 0x1c2   :  { %442 = vadd.xlane.f32.xlu0 %v589_v61 }
 0x24b   :  { %v443_v62 = vpop.xlane.xlu0 %442 }
 0x24c   :  { %590 = vrcp.f32 %v443_v62 }
 0x259   :  { %v591_v63 = vpop.eup %590 }
 0x25a   :  { %v445_v0 = vmul.f32 %v591_v63, %v589_v61 }
 0x25c   :  { %447 = vst.msk [vmem:[#allocation7] sm:$0xff] %vm446_vm2, %v445_v0 }
 0x25d   :  { %643 = shalt.err (!%p640_p0)
}
 0x25e   :  { %457 = dma.vmem_to_hbm [thread:$0]  %s455_s25, 128, %s700_s3, [#allocation4]  }
 0x25f   :  { %656 = dma.done.wait [#allocation4], 128  }
 0x260   :  { %657 = vsyncadd [#allocation4], 4294967168 }
 0x261   :  { %461 = vsyncpa [#allocation3], 1 }
 0x262   :  { %462 = vsyncpa [#allocation6], 1 }
 0x263   :  { %463 = vsyncpa [#allocation4], 1 }

</bundles_post_ra>
